<compile_context>
chip_gen: v5e
topology: v5e:2x2
jax: 0.10.0
libtpu: 0.0.40
codegen_flags: <defaults>
</compile_context>

<pallas_src>
import math

import jax
import jax.numpy as jnp
from jax.experimental import pallas as pl
from jax.experimental.pallas import tpu as pltpu

_LANE = 128            # TPU lane width
_MAX_BATCH_TILE = 2048  # per-step batch rows; VMEM footprint stays tiny


def _round_up(x, m):
    return ((x + m - 1) // m) * m


def _dqn_kernel(x_ref, w1_ref, b1_ref, w2_ref, b2_ref, o_ref):
    # Cast the x tile to bf16 in-kernel (saves a wrapper-side cast op; tile is tiny).
    x = x_ref[...].astype(jnp.bfloat16)
    # Hidden layer: (TB, S) @ (S, Hp) -> f32 acc; bias-add + ReLU in f32 on the VPU.
    h = jnp.dot(x, w1_ref[...], preferred_element_type=jnp.float32)
    h = jnp.maximum(h + b1_ref[...], 0.0)
    # Output layer: (TB, Hp) @ (Hp, A) -> f32 acc; only the real A columns are
    # computed and stored (no padded writeback).
    q = jnp.dot(h.astype(jnp.bfloat16), w2_ref[...],
                preferred_element_type=jnp.float32)
    o_ref[...] = (q + b2_ref[...]).astype(o_ref.dtype)


def prepare_dqn_params(w1, b1, w2, b2):
    """One-time prep: pad hidden dim to a lane-dense 128 and cast weights to bf16.

    Do this ONCE per parameter update, outside the per-step hot path.
    w1: (S, H) f32   b1: (1, H) or (H,) f32   w2: (H, A) f32   b2: (1, A) or (A,) f32
    """
    S, H = w1.shape
    H2, A = w2.shape
    assert H == H2
    Hp = _round_up(H, _LANE)
    w1_p = jnp.pad(w1, ((0, 0), (0, Hp - H))).astype(jnp.bfloat16)
    b1_p = jnp.pad(jnp.reshape(b1, (1, H)),
                   ((0, 0), (0, Hp - H))).astype(jnp.float32)
    w2_p = jnp.pad(w2, ((0, Hp - H), (0, 0))).astype(jnp.bfloat16)   # (Hp, A)
    b2_p = jnp.reshape(b2, (1, A)).astype(jnp.float32)
    return w1_p, b1_p, w2_p, b2_p


def _batch_tiling(B, block_batch):
    """Pick (TB, Bp, steps): 16-aligned tiles, >=2 steps for batches >= 32 so the
    'parallel' axis can shard across v7x's two TensorCores, and no pathological
    batch padding."""
    if B <= block_batch:
        if B >= 32 and B % 16 == 0:
            tb = max(16, _round_up(B // 2, 16))
            if B % tb == 0:
                return tb, B, B // tb
        # Single block covering the full (possibly unaligned) batch:
        # block dims == full array dims is always legal.
        return B, B, 1
    tb = block_batch
    bp = _round_up(B, tb)
    return tb, bp, bp // tb


def dqn_forward(x, params, *, block_batch=_MAX_BATCH_TILE):
    """Fused DQN MLP forward.

    x      : (B, S) f32
    params : output of prepare_dqn_params()
    returns (B, A) f32  ==  ReLU(x @ w1 + b1) @ w2 + b2
    """
    w1_p, b1_p, w2_p, b2_p = params
    B, S = x.shape
    S_w, Hp = w1_p.shape
    A = w2_p.shape[1]
    assert S == S_w

    TB, Bp, steps = _batch_tiling(B, block_batch)
    x_in = x if Bp == B else jnp.pad(x, ((0, Bp - B), (0, 0)))

    flops = 2 * Bp * (S * Hp + Hp * A)
    bytes_accessed = (x_in.size * 4            # x read (f32)
                      + w1_p.size * 2 + w2_p.size * 2
                      + b1_p.size * 4 + b2_p.size * 4
                      + Bp * A * 4)            # un-padded output write

    q = pl.pallas_call(
        _dqn_kernel,
        out_shape=jax.ShapeDtypeStruct((Bp, A), jnp.float32),
        grid_spec=pltpu.PrefetchScalarGridSpec(
            num_scalar_prefetch=0,
            grid=(steps,),
            in_specs=[
                pl.BlockSpec((TB, S), lambda i: (i, 0)),   # x tile (pipelined)
                pl.BlockSpec((S, Hp), lambda i: (0, 0)),   # w1, VMEM-resident
                pl.BlockSpec((1, Hp), lambda i: (0, 0)),   # b1, VMEM-resident
                pl.BlockSpec((Hp, A), lambda i: (0, 0)),   # w2, VMEM-resident
                pl.BlockSpec((1, A), lambda i: (0, 0)),    # b2, VMEM-resident
            ],
            out_specs=pl.BlockSpec((TB, A), lambda i: (i, 0)),  # real A cols only
        ),
        compiler_params=pltpu.CompilerParams(
            dimension_semantics=("parallel",),
        ),
        cost_estimate=pl.CostEstimate(
            flops=flops, bytes_accessed=bytes_accessed, transcendentals=0),
    )(x_in, w1_p, b1_p, w2_p, b2_p)

    return q if Bp == B else q[:B]


def init_dqn_params(key, state_dim, action_dim, hidden=64):
    """Mimics PyTorch nn.Linear default init: U(-1/sqrt(fan_in), 1/sqrt(fan_in))."""
    k1, k2, k3, k4 = jax.random.split(key, 4)
    bound1 = 1.0 / math.sqrt(state_dim)
    bound2 = 1.0 / math.sqrt(hidden)
    w1 = jax.random.uniform(k1, (state_dim, hidden), jnp.float32, -bound1, bound1)
    b1 = jax.random.uniform(k2, (1, hidden), jnp.float32, -bound1, bound1)
    w2 = jax.random.uniform(k3, (hidden, action_dim), jnp.float32, -bound2, bound2)
    b2 = jax.random.uniform(k4, (1, action_dim), jnp.float32, -bound2, bound2)
    return w1, b1, w2, b2


def _ref_bf16(x, w1, b1, w2, b2):
    """Matched-precision reference (bf16 operands, f32 accumulation)."""
    h = jnp.maximum(
        jnp.dot(x.astype(jnp.bfloat16), w1.astype(jnp.bfloat16),
                preferred_element_type=jnp.float32) + b1.reshape(1, -1), 0.0)
    return jnp.dot(h.astype(jnp.bfloat16), w2.astype(jnp.bfloat16),
                   preferred_element_type=jnp.float32) + b2.reshape(1, -1)


if __name__ == "__main__":
    key = jax.random.PRNGKey(0)
    kx, kb, kp = jax.random.split(key, 3)

    state_dim = 8        # small static-mode state vector
    action_dim = 4
    hidden = 64

    w1, b1, w2, b2 = init_dqn_params(kp, state_dim, action_dim, hidden)
    params = prepare_dqn_params(w1, b1, w2, b2)   # one-time, outside hot path

    # Case 1: tiny batch (acting), single-block path, no padding at all.
    batch = 2
    x = jax.random.normal(kx, (batch, state_dim), dtype=jnp.float32)
    q = jax.block_until_ready(dqn_forward(x, params))
    assert q.shape == (batch, action_dim)
    q_ref = _ref_bf16(x, w1, b1, w2, b2)
    assert jnp.allclose(q, q_ref, atol=1e-3, rtol=1e-3)
    q_f32 = jnp.maximum(x @ w1 + b1, 0.0) @ w2 + b2
    assert jnp.allclose(q, q_f32, atol=2e-2, rtol=2e-2)

    # Case 2: replay-buffer batch, 2-step grid (dual-TC shardable on v7x).
    batch2 = 256
    x2 = jax.random.normal(kb, (batch2, state_dim), dtype=jnp.float32)
    q2 = jax.block_until_ready(dqn_forward(x2, params))
    assert q2.shape == (batch2, action_dim)
    assert jnp.allclose(q2, _ref_bf16(x2, w1, b1, w2, b2), atol=1e-3, rtol=1e-3)
    assert jnp.allclose(q2, jnp.maximum(x2 @ w1 + b1, 0.0) @ w2 + b2,
                        atol=2e-2, rtol=2e-2)

    print("KERNEL_OK")
</pallas_src>

<mosaic_0001>
module attributes {stable_mosaic.version = 11 : i64} {
  func.func @_dqn_kernel(%arg0: i32, %arg1: memref<2x8xf32, #tpu.memory_space<vmem>>, %arg2: memref<8x128xbf16, #tpu.memory_space<vmem>>, %arg3: memref<1x128xf32, #tpu.memory_space<vmem>>, %arg4: memref<128x4xbf16, #tpu.memory_space<vmem>>, %arg5: memref<1x4xf32, #tpu.memory_space<vmem>>, %arg6: memref<2x4xf32, #tpu.memory_space<vmem>>) attributes {dimension_semantics = [#tpu.dimension_semantics<parallel>], iteration_bounds = array<i64: 1>, scalar_prefetch = 0 : i64, scratch_operands = 0 : i64, tpu.core_type = #tpu.core_type<tc>, window_params = [{transform_indices = @transform_0, window_bounds = array<i64: 2, 8>}, {pipeline_mode = #tpu.pipeline_mode<synchronous>, transform_indices = @transform_1, window_bounds = array<i64: 8, 128>}, {pipeline_mode = #tpu.pipeline_mode<synchronous>, transform_indices = @transform_2, window_bounds = array<i64: 1, 128>}, {pipeline_mode = #tpu.pipeline_mode<synchronous>, transform_indices = @transform_3, window_bounds = array<i64: 128, 4>}, {pipeline_mode = #tpu.pipeline_mode<synchronous>, transform_indices = @transform_4, window_bounds = array<i64: 1, 4>}, {transform_indices = @transform_5, window_bounds = array<i64: 2, 4>}]} {
    %c0 = arith.constant 0 : index
    %c0_0 = arith.constant 0 : index
    %0 = vector.load %arg1[%c0, %c0_0] : memref<2x8xf32, #tpu.memory_space<vmem>>, vector<2x8xf32>
    %1 = arith.truncf %0 : vector<2x8xf32> to vector<2x8xbf16>
    %c0_1 = arith.constant 0 : index
    %c0_2 = arith.constant 0 : index
    %2 = vector.load %arg2[%c0_1, %c0_2] : memref<8x128xbf16, #tpu.memory_space<vmem>>, vector<8x128xbf16>
    %cst = arith.constant dense<0.000000e+00> : vector<2x128xf32>
    %3 = tpu.matmul %1, %2, %cst {dimension_numbers = #tpu.dot_dimension_numbers<[1], [0], [0], [1], [0, 0, 1, 1], [], []>} : vector<2x8xbf16>, vector<8x128xbf16>, vector<2x128xf32> -> vector<2x128xf32>
    %c0_3 = arith.constant 0 : index
    %c0_4 = arith.constant 0 : index
    %4 = vector.load %arg3[%c0_3, %c0_4] : memref<1x128xf32, #tpu.memory_space<vmem>>, vector<1x128xf32>
    %5 = vector.broadcast %4 : vector<1x128xf32> to vector<2x128xf32>
    %6 = arith.addf %3, %5 : vector<2x128xf32>
    %cst_5 = arith.constant 0.000000e+00 : f32
    %7 = vector.broadcast %cst_5 : f32 to vector<2x128xf32>
    %8 = arith.maximumf %6, %7 : vector<2x128xf32>
    %9 = arith.truncf %8 : vector<2x128xf32> to vector<2x128xbf16>
    %c0_6 = arith.constant 0 : index
    %c0_7 = arith.constant 0 : index
    %10 = vector.load %arg4[%c0_6, %c0_7] : memref<128x4xbf16, #tpu.memory_space<vmem>>, vector<128x4xbf16>
    %cst_8 = arith.constant dense<0.000000e+00> : vector<2x4xf32>
    %11 = tpu.matmul %9, %10, %cst_8 {dimension_numbers = #tpu.dot_dimension_numbers<[1], [0], [0], [1], [0, 0, 1, 1], [], []>} : vector<2x128xbf16>, vector<128x4xbf16>, vector<2x4xf32> -> vector<2x4xf32>
    %c0_9 = arith.constant 0 : index
    %c0_10 = arith.constant 0 : index
    %12 = vector.load %arg5[%c0_9, %c0_10] : memref<1x4xf32, #tpu.memory_space<vmem>>, vector<1x4xf32>
    %13 = vector.broadcast %12 : vector<1x4xf32> to vector<2x4xf32>
    %14 = arith.addf %11, %13 : vector<2x4xf32>
    %c0_11 = arith.constant 0 : index
    %c0_12 = arith.constant 0 : index
    %15 = vector.load %arg6[%c0_11, %c0_12] : memref<2x4xf32, #tpu.memory_space<vmem>>, vector<2x4xf32>
    tpu.vector_store %arg6[%c0_11, %c0_12], %14 {strides = array<i32>} : memref<2x4xf32, #tpu.memory_space<vmem>>, vector<2x4xf32>,
    return
  }
  func.func @transform_0(%arg0: i32) -> (i32, i32) {
    %c0_i32 = arith.constant 0 : i32
    %c0_i32_0 = arith.constant 0 : i32
    return %arg0, %c0_i32 : i32, i32
  }
  func.func @transform_1(%arg0: i32) -> (i32, i32) {
    %c0_i32 = arith.constant 0 : i32
    %c0_i32_0 = arith.constant 0 : i32
    %c0_i32_1 = arith.constant 0 : i32
    return %c0_i32, %c0_i32_0 : i32, i32
  }
  func.func @transform_2(%arg0: i32) -> (i32, i32) {
    %c0_i32 = arith.constant 0 : i32
    %c0_i32_0 = arith.constant 0 : i32
    %c0_i32_1 = arith.constant 0 : i32
    return %c0_i32, %c0_i32_0 : i32, i32
  }
  func.func @transform_3(%arg0: i32) -> (i32, i32) {
    %c0_i32 = arith.constant 0 : i32
    %c0_i32_0 = arith.constant 0 : i32
    %c0_i32_1 = arith.constant 0 : i32
    return %c0_i32, %c0_i32_0 : i32, i32
  }
  func.func @transform_4(%arg0: i32) -> (i32, i32) {
    %c0_i32 = arith.constant 0 : i32
    %c0_i32_0 = arith.constant 0 : i32
    %c0_i32_1 = arith.constant 0 : i32
    return %c0_i32, %c0_i32_0 : i32, i32
  }
  func.func @transform_5(%arg0: i32) -> (i32, i32) {
    %c0_i32 = arith.constant 0 : i32
    %c0_i32_0 = arith.constant 0 : i32
    return %arg0, %c0_i32 : i32, i32
  }
}

</mosaic_0001>

<bundles_post_ra>
// kernel: tpu_custom_call.1
= control target key start
LH: loop header
LB: loop body
LE: loop exit
PB: predicated region body
PF: predicated region fallthrough
CT: control target
= control target key end

     0   :  { %vm33_vm0 = vcmask 1043456   ;;  %vm29_vm1 = vcmask 64512   ;;  %s291_s0 = inlined_call_operand.vmem [shape: f32[2,8], index: 0, kind: input, shape index: {}]   ;;  %s292_s1 = inlined_call_operand.vmem [shape: bf16[8,128], index: 1, kind: input, shape index: {}]   ;;  %s293_s2 = inlined_call_operand.vmem [shape: f32[1,128], index: 2, kind: input, shape index: {}]   ;;  %s294_s3 = inlined_call_operand.vmem [shape: bf16[128,4], index: 3, kind: input, shape index: {}]   ;;  %s295_s4 = inlined_call_operand.vmem [shape: f32[1,4], index: 4, kind: input, shape index: {}]   ;;  %s296_s5 = inlined_call_operand.hbm [shape: f32[2,4], index: 5, kind: output, shape index: {}]  }
   0x1   :  { %v24_v0 = vld [vmem:[%s292_s1] sm:$0xf]  ;;  %v191_v4 = vld [vmem:[%s294_s3 + $0x38] sm:$0xff]  ;;  %v190_v5 = vld [vmem:[%s294_s3 + $0x30] sm:$0xff] }
   0x2   :  { %v22_v1 = vld [vmem:[%s291_s0] sm:$0x3]  ;;  %v35_v2 = vsel %vm33_vm0, %v24_v0, 0  ;;  %120 = vmatpush.bf16.msra.mxu1 %v191_v4 }
   0x3   :  { %v23_v3 = vpack.c.bf16 %v22_v1, %v22_v1  ;;  %44 = vmatpush.bf16.msra.mxu0 %v35_v2 }
   0x4   :  { %10 = vsyncpa [#allocation3], 0  ;;  %v189_v6 = vld [vmem:[%s294_s3 + $0x28] sm:$0xff]  ;;  %v188_v7 = vld [vmem:[%s294_s3 + $0x20] sm:$0xff]  ;;  %s221_s15 = smov [#allocation2]   ;;  %vm133_vm2 = vcmask 25600  }
   0x5   :  { %v187_v8 = vld [vmem:[%s294_s3 + $0x18] sm:$0xff]  ;;  %v186_v9 = vld [vmem:[%s294_s3 + $0x10] sm:$0xff]  ;;  %v185_v10 = vld [vmem:[%s294_s3 + $0x8] sm:$0xff]  ;;  %s140_s16 = sshll.u32 %s221_s15, 4  ;;  %s141_s16 = int_to_ptr.vmem [resolvable:$true] %s140_s16 }
   0x6   :  { %151 = vmatmul.msk.bf16.vlgmr.msra.gmra.mxu0 %vm29_vm1, %v23_v3  ;;  %121 = vmatpush.bf16.msra.mxu1 %v190_v5  ;;  %v184_v11 = vld [vmem:[%s294_s3] sm:$0xff]  ;;  %s142_s3 = sshll.u32 %s296_s5, 4  ;;  %s143_s3 = int_to_ptr.hbm [resolvable:$true] %s142_s3 }
   0x7   :  { %v193_v12 = vld [vmem:[%s293_s2] ss:$0 sm:$0xff] }
   0x8   :  { %v194_v18 = vld [vmem:[%s295_s4] ss:$0 sm:$0xff] }
   0xa   :  { %122 = vmatpush.bf16.msra.mxu1 %v189_v6 }
   0xe   :  { %123 = vmatpush.bf16.msra.mxu1 %v188_v7 }
  0x12   :  { %124 = vmatpush.bf16.msra.mxu1 %v187_v8 }
  0x16   :  { %125 = vmatpush.bf16.msra.mxu1 %v186_v9 }
  0x1a   :  { %126 = vmatpush.bf16.msra.mxu1 %v185_v10 }
  0x1e   :  { %127 = vmatpush.bf16.msra.mxu1 %v184_v11 }
  0x83   :  { %v46_v13 = vpop.f32.mrf.mxu0 }
  0x84   :  { %v47_v14 = vadd.f32 %v193_v12, %v46_v13 }
  0x86   :  { %v50_v15 = vmax.f32 %v47_v14, 0.0 }
  0x88   :  { %v51_v16 = vpack.c.bf16 %v50_v15, %v50_v15 }
  0x8a   :  { %128 = vmatmul.bf16.vlgmr.msra.gmra.mxu1 %v51_v16 }
  0x8b   :  { %v48_v17 = vpop.f32.mrf.mxu0 }
 0x107   :  { %v129_v19 = vpop.f32.mrf.mxu1 }
 0x108   :  { %v130_v20 = vadd.f32 %v194_v18, %v129_v19 }
 0x10a   :  { %134 = vst.msk [vmem:[#allocation2] sm:$0x3] %vm133_vm2, %v130_v20 }
 0x10b   :  { %145 = dma.vmem_to_hbm [thread:$0]  %s141_s16, 32, %s143_s3, [#allocation3]  }
 0x10f   :  { %v131_v21 = vpop.f32.mrf.mxu1 }
 0x110   :  { %219 = dma.done.wait [#allocation3], 32  }
 0x111   :  { %220 = vsyncadd [#allocation3], 4294967264 }
 0x112   :  { %150 = vsyncpa [#allocation3], 1 }

</bundles_post_ra>
